<compile_context>
chip_gen: v7x
topology: tpu7x:2x2x1
jax: 0.10.0
libtpu: 0.0.40
codegen_flags: <defaults>
</compile_context>

<pallas_src>
import functools

import jax
import jax.numpy as jnp
import numpy as np
from jax.experimental import pallas as pl
from jax.experimental.pallas import tpu as pltpu

L = 64    # self.L
D = 36    # self.D
K = 1     # self.K
THRES = 0.5
LANE = 128


def _round_up(v, m):
    return ((v + m - 1) // m) * m


def _attset_kernel(x_ref, w1_ref, b1_ref, wc_ref, bc_ref, yprob_ref, *, n_inst):
    """One tile of TB bags: Linear+ReLU -> (implicit all-ones attention) sum
    pooling -> Linear+Sigmoid, stored lane-dense as (1, TB)."""
    rows, _ = x_ref.shape                     # rows == TB * n_inst
    tb = rows // n_inst
    lh = w1_ref.shape[1]

    # feature_extractor_part2: one MXU matmul over all TB*N instances.
    # x/w1 may be bf16 (full-rate MXU); accumulation is f32.
    h = jnp.dot(x_ref[...], w1_ref[...],
                preferred_element_type=jnp.float32) + b1_ref[...]
    h = jnp.maximum(h, 0.0)                   # (TB*N, L), f32

    # Attention softmax over the singleton K axis == 1.0 for finite logits,
    # so torch.bmm(A_soft, H) reduces to a per-bag sum over instances.
    m = jnp.sum(h.reshape(tb, n_inst, lh), axis=1)                      # (TB, L)

    # classifier Linear(L*K, 1) + Sigmoid: 1-wide projection on the VPU
    # (broadcast-mul + lane reduce) instead of a 1-column MXU pass.
    logit = jnp.sum(m * wc_ref[...], axis=1, keepdims=True) + bc_ref[...]  # (TB, 1)
    # Sublane->lane relayout of TB scalars; only cross-lane movement left.
    yprob_ref[...] = jax.nn.sigmoid(logit).reshape(1, tb)


def _small_batch_forward(x, w1, b1, wc, bc, thres):
    """Fused pure-XLA path for tiny B (custom-call launch would dominate)."""
    h = jax.nn.relu(x @ w1 + b1)              # (B, N, L)
    m = jnp.sum(h, axis=1)                    # (B, L)   (dead attention == sum)
    y_prob = jax.nn.sigmoid(m @ wc + bc)      # (B, 1)
    y_hat = (y_prob >= thres).astype(jnp.float32)
    return y_prob, y_hat


def profile_attset_forward(x, params, thres=THRES, *,
                           input_dtype=jnp.bfloat16,
                           min_pallas_bags=256,
                           max_tile_bags=1024,
                           vmem_budget_bytes=24 << 20):
    """x: (1, B, N, F) float32, like the torch module input before squeeze(0)."""
    x = jnp.squeeze(x, axis=0)                                          # (B, N, F)
    B, N, F_in = x.shape
    w1, b1, wa1, ba1, wa2, ba2, wc, bc = params
    del wa1, ba1, wa2, ba2  # dead math: attention weights never reach the output

    # Tiny batches: skip the Pallas custom call entirely (P: launch-bound).
    if B < min_pallas_bags and min_pallas_bags > 0:
        return _small_batch_forward(x, w1, b1, wc, bc, thres)

    wc_row = wc.reshape(1, L * K)                                       # (1, L)
    itemsize = jnp.dtype(input_dtype).itemsize

    # --- Bag tiling ------------------------------------------------------
    if B <= LANE:
        TB, B_pad, n_tiles = B, B, 1
    else:
        # VMEM budget per bag: double-buffered lane-padded x block + f32 h temp
        # (+ small m/logit slack).  Keeps the total under ~24 MiB everywhere
        # (v5e 16 MiB default raised below, v7x 64 MiB physical).
        x_bytes_per_bag = N * LANE * itemsize
        h_bytes_per_bag = N * LANE * 4
        per_bag = 2 * x_bytes_per_bag + h_bytes_per_bag + 2 * LANE * 4
        tb_vmem = max(LANE, (vmem_budget_bytes // per_bag) // LANE * LANE)
        TB = min(max_tile_bags, tb_vmem)
        # Keep >= 2 tiles so the "parallel" bag axis can split across the two
        # TensorCores on v7x instead of serializing on one.
        half = _round_up(-(-B // 2), LANE)
        TB = max(LANE, min(TB, half))
        B_pad = _round_up(B, TB)
        n_tiles = B_pad // TB

    if B_pad != B:
        x = jnp.pad(x, ((0, B_pad - B), (0, 0), (0, 0)))
    # Flatten to (B_pad*N, F): contiguous HBM runs, clean 8-multiple sublane dim.
    x_flat = x.reshape(B_pad * N, F_in).astype(input_dtype)
    w1_in = w1.astype(input_dtype)

    grid_spec = pl.GridSpec(
        grid=(n_tiles,),
        in_specs=[
            pl.BlockSpec((TB * N, F_in), lambda i: (i, 0)),  # tile of TB bags
            pl.BlockSpec((F_in, L), lambda i: (0, 0)),       # resident weights
            pl.BlockSpec((1, L), lambda i: (0, 0)),
            pl.BlockSpec((1, L * K), lambda i: (0, 0)),
            pl.BlockSpec((1, 1), lambda i: (0, 0)),
        ],
        # Lane-dense output: bags on the lane axis, one block per grid step.
        out_specs=pl.BlockSpec((1, TB), lambda i: (0, i)),
    )

    cost = pl.CostEstimate(
        flops=2 * B_pad * N * F_in * L + 3 * B_pad * L,
        transcendentals=B_pad,
        bytes_accessed=(x_flat.size * itemsize
                        + w1_in.size * itemsize
                        + (b1.size + wc_row.size + bc.size + B_pad) * 4),
    )

    y_prob_row = pl.pallas_call(
        functools.partial(_attset_kernel, n_inst=N),
        grid_spec=grid_spec,
        out_shape=jax.ShapeDtypeStruct((1, B_pad), jnp.float32),
        compiler_params=pltpu.CompilerParams(
            dimension_semantics=("parallel",),
            vmem_limit_bytes=32 * 1024 * 1024,
        ),
        cost_estimate=cost,
    )(x_flat, w1_in, b1, wc_row, bc)

    y_prob = y_prob_row[:, :B].T                                        # (B, 1)
    y_hat = (y_prob >= thres).astype(jnp.float32)                       # cheap, in XLA
    return y_prob, y_hat


def reference_forward(x, params):
    """Pure-JAX replica of the torch forward (full attention math, for checking)."""
    x = jnp.squeeze(x, axis=0)
    w1, b1, wa1, ba1, wa2, ba2, wc, bc = params
    h = jax.nn.relu(x @ w1 + b1[0])                                     # (B, N, L)
    a = jnp.tanh(h @ wa1 + ba1[0]) @ wa2 + ba2[0]                       # (B, N, 1)
    a_t = jnp.transpose(a, (0, 2, 1))                                   # (B, 1, N)
    a_soft = jax.nn.softmax(a_t, axis=1)                                # over singleton dim
    m = jnp.einsum('bkn,bnl->bkl', a_soft, h)                           # (B, 1, L)
    y_prob = jax.nn.sigmoid(jnp.einsum('bkl,lo->bko', m, wc) + bc[0])   # (B, 1, 1)
    y_prob = y_prob[:, :, 0]                                            # (B, 1)
    y_hat = (y_prob >= THRES).astype(jnp.float32)
    return y_prob, y_hat


if __name__ == "__main__":
    F_in, B, N = 32, 2, 8
    key = jax.random.PRNGKey(0)
    ks = jax.random.split(key, 10)

    # Deterministic synthetic parameters (shapes from the module __init__).
    w1 = jax.random.normal(ks[0], (F_in, L), jnp.float32) / np.sqrt(F_in)
    b1 = jax.random.normal(ks[1], (1, L), jnp.float32) * 0.01
    wa1 = jax.random.normal(ks[2], (L, D), jnp.float32) / np.sqrt(L)
    ba1 = jax.random.normal(ks[3], (1, D), jnp.float32) * 0.01
    wa2 = jax.random.normal(ks[4], (D, K), jnp.float32) / np.sqrt(D)
    ba2 = jax.random.normal(ks[5], (1, K), jnp.float32) * 0.01
    wc = jax.random.normal(ks[6], (L * K, 1), jnp.float32) / np.sqrt(L)
    bc = jax.random.normal(ks[7], (1, 1), jnp.float32) * 0.01
    params = (w1, b1, wa1, ba1, wa2, ba2, wc, bc)

    # --- Test 1: tiny batch, force the Pallas kernel in exact f32 mode ----
    x_small = jax.random.normal(ks[8], (1, B, N, F_in), jnp.float32)
    y_prob, y_hat = jax.block_until_ready(
        profile_attset_forward(x_small, params,
                               input_dtype=jnp.float32,
                               min_pallas_bags=0))
    ref_prob, ref_hat = reference_forward(x_small, params)
    np.testing.assert_allclose(np.asarray(y_prob), np.asarray(ref_prob),
                               rtol=1e-5, atol=1e-5)
    np.testing.assert_allclose(np.asarray(y_hat), np.asarray(ref_hat))

    # --- Test 2: larger batch, default dispatch (bf16 MXU boundary, 2 tiles)
    B2 = 300
    x_big = jax.random.normal(ks[9], (1, B2, N, F_in), jnp.float32)
    y_prob2, y_hat2 = jax.block_until_ready(
        profile_attset_forward(x_big, params))          # bf16 path, padded bags
    ref_prob2, _ = reference_forward(x_big, params)
    # bf16 HBM/MXU boundary -> looser tolerance vs the f32 reference.
    np.testing.assert_allclose(np.asarray(y_prob2), np.asarray(ref_prob2),
                               rtol=5e-2, atol=5e-2)
    assert y_prob2.shape == (B2, 1) and y_hat2.shape == (B2, 1)

    print("KERNEL_OK")
</pallas_src>

<mosaic_0001>
module attributes {stable_mosaic.version = 11 : i64} {
  func.func @_attset_kernel(%arg0: i32, %arg1: memref<16x32xf32, #tpu.memory_space<vmem>>, %arg2: memref<32x64xf32, #tpu.memory_space<vmem>>, %arg3: memref<1x64xf32, #tpu.memory_space<vmem>>, %arg4: memref<1x64xf32, #tpu.memory_space<vmem>>, %arg5: memref<1x1xf32, #tpu.memory_space<vmem>>, %arg6: memref<1x2xf32, #tpu.memory_space<vmem>>) attributes {dimension_semantics = [#tpu.dimension_semantics<parallel>], iteration_bounds = array<i64: 1>, scalar_prefetch = 0 : i64, scratch_operands = 0 : i64, tpu.core_type = #tpu.core_type<tc>, window_params = [{transform_indices = @transform_0, window_bounds = array<i64: 16, 32>}, {pipeline_mode = #tpu.pipeline_mode<synchronous>, transform_indices = @transform_1, window_bounds = array<i64: 32, 64>}, {pipeline_mode = #tpu.pipeline_mode<synchronous>, transform_indices = @transform_2, window_bounds = array<i64: 1, 64>}, {pipeline_mode = #tpu.pipeline_mode<synchronous>, transform_indices = @transform_3, window_bounds = array<i64: 1, 64>}, {pipeline_mode = #tpu.pipeline_mode<synchronous>, transform_indices = @transform_4, window_bounds = array<i64: 1, 1>}, {transform_indices = @transform_5, window_bounds = array<i64: 1, 2>}]} {
    %c0 = arith.constant 0 : index
    %c0_0 = arith.constant 0 : index
    %0 = vector.load %arg1[%c0, %c0_0] : memref<16x32xf32, #tpu.memory_space<vmem>>, vector<16x32xf32>
    %c0_1 = arith.constant 0 : index
    %c0_2 = arith.constant 0 : index
    %1 = vector.load %arg2[%c0_1, %c0_2] : memref<32x64xf32, #tpu.memory_space<vmem>>, vector<32x64xf32>
    %cst = arith.constant dense<0.000000e+00> : vector<16x64xf32>
    %2 = tpu.matmul %0, %1, %cst {dimension_numbers = #tpu.dot_dimension_numbers<[1], [0], [0], [1], [0, 0, 1, 1], [], []>} : vector<16x32xf32>, vector<32x64xf32>, vector<16x64xf32> -> vector<16x64xf32>
    %c0_3 = arith.constant 0 : index
    %c0_4 = arith.constant 0 : index
    %3 = vector.load %arg3[%c0_3, %c0_4] : memref<1x64xf32, #tpu.memory_space<vmem>>, vector<1x64xf32>
    %4 = vector.broadcast %3 : vector<1x64xf32> to vector<16x64xf32>
    %5 = arith.addf %2, %4 : vector<16x64xf32>
    %cst_5 = arith.constant 0.000000e+00 : f32
    %6 = vector.broadcast %cst_5 : f32 to vector<16x64xf32>
    %7 = arith.maximumf %5, %6 : vector<16x64xf32>
    %8 = vector.shape_cast %7 : vector<16x64xf32> to vector<2x8x64xf32>
    %cst_6 = arith.constant dense<0.000000e+00> : vector<2x64xf32>
    %9 = vector.multi_reduction <add>, %8, %cst_6 [1] : vector<2x8x64xf32> to vector<2x64xf32>
    %c0_7 = arith.constant 0 : index
    %c0_8 = arith.constant 0 : index
    %10 = vector.load %arg4[%c0_7, %c0_8] : memref<1x64xf32, #tpu.memory_space<vmem>>, vector<1x64xf32>
    %11 = vector.broadcast %10 : vector<1x64xf32> to vector<2x64xf32>
    %12 = arith.mulf %9, %11 : vector<2x64xf32>
    %cst_9 = arith.constant dense<0.000000e+00> : vector<2xf32>
    %13 = vector.multi_reduction <add>, %12, %cst_9 [1] : vector<2x64xf32> to vector<2xf32>
    %14 = vector.shape_cast %13 : vector<2xf32> to vector<2x1xf32>
    %c0_10 = arith.constant 0 : index
    %c0_11 = arith.constant 0 : index
    %15 = vector.load %arg5[%c0_10, %c0_11] : memref<1x1xf32, #tpu.memory_space<vmem>>, vector<1x1xf32>
    %16 = vector.broadcast %15 : vector<1x1xf32> to vector<2x1xf32>
    %17 = arith.addf %14, %16 : vector<2x1xf32>
    %18 = arith.negf %17 : vector<2x1xf32>
    %19 = math.exp %18 : vector<2x1xf32>
    %cst_12 = arith.constant 1.000000e+00 : f32
    %20 = vector.broadcast %cst_12 : f32 to vector<2x1xf32>
    %21 = arith.addf %20, %19 : vector<2x1xf32>
    %22 = arith.divf %20, %21 : vector<2x1xf32>
    %23 = vector.shape_cast %22 : vector<2x1xf32> to vector<1x2xf32>
    %c0_13 = arith.constant 0 : index
    %c0_14 = arith.constant 0 : index
    %24 = vector.load %arg6[%c0_13, %c0_14] : memref<1x2xf32, #tpu.memory_space<vmem>>, vector<1x2xf32>
    tpu.vector_store %arg6[%c0_13, %c0_14], %23 {strides = array<i32>} : memref<1x2xf32, #tpu.memory_space<vmem>>, vector<1x2xf32>,
    return
  }
  func.func @transform_0(%arg0: i32) -> (i32, i32) {
    %c0_i32 = arith.constant 0 : i32
    %c0_i32_0 = arith.constant 0 : i32
    return %arg0, %c0_i32 : i32, i32
  }
  func.func @transform_1(%arg0: i32) -> (i32, i32) {
    %c0_i32 = arith.constant 0 : i32
    %c0_i32_0 = arith.constant 0 : i32
    %c0_i32_1 = arith.constant 0 : i32
    return %c0_i32, %c0_i32_0 : i32, i32
  }
  func.func @transform_2(%arg0: i32) -> (i32, i32) {
    %c0_i32 = arith.constant 0 : i32
    %c0_i32_0 = arith.constant 0 : i32
    %c0_i32_1 = arith.constant 0 : i32
    return %c0_i32, %c0_i32_0 : i32, i32
  }
  func.func @transform_3(%arg0: i32) -> (i32, i32) {
    %c0_i32 = arith.constant 0 : i32
    %c0_i32_0 = arith.constant 0 : i32
    %c0_i32_1 = arith.constant 0 : i32
    return %c0_i32, %c0_i32_0 : i32, i32
  }
  func.func @transform_4(%arg0: i32) -> (i32, i32) {
    %c0_i32 = arith.constant 0 : i32
    %c0_i32_0 = arith.constant 0 : i32
    %c0_i32_1 = arith.constant 0 : i32
    return %c0_i32, %c0_i32_0 : i32, i32
  }
  func.func @transform_5(%arg0: i32) -> (i32, i32) {
    %c0_i32 = arith.constant 0 : i32
    %c0_i32_0 = arith.constant 0 : i32
    return %c0_i32, %arg0 : i32, i32
  }
}

</mosaic_0001>

<bundles_post_ra>
// kernel: tpu_custom_call.1
= control target key start
LH: loop header
LB: loop body
LE: loop exit
PB: predicated region body
PF: predicated region fallthrough
CT: control target
= control target key end

     0   :  { %s420_s0 = inlined_call_operand.hbm [shape: f32[16,32], index: 0, kind: input, shape index: {}]   ;;  %s421_s1 = inlined_call_operand.hbm [shape: f32[32,64], index: 1, kind: input, shape index: {}]   ;;  %s422_s2 = inlined_call_operand.vmem [shape: f32[1,64], index: 2, kind: input, shape index: {}]   ;;  %s423_s3 = inlined_call_operand.vmem [shape: f32[1,64], index: 3, kind: input, shape index: {}]   ;;  %s424_s4 = inlined_call_operand.<no memory space> [shape: f32[1,1], index: 4, kind: input, shape index: {}]   ;;  %s425_s5 = inlined_call_operand.hbm [shape: f32[1,2], index: 5, kind: output, shape index: {}]  }
   0x1   :  { %v10_v0 = vstv %s424_s4 }
   0x2   :  { %11 = vst [vmem:[#allocation2] sm:$0x1] %v10_v0 }
   0x3   :  { %12 = vsyncpa [#allocation4], 0 }
   0x4   :  { %13 = vsyncpa [#allocation7], 0 }
   0x5   :  { %14 = vsyncpa [#allocation5], 0  ;;  %s339_s20 = smov [#allocation3]   ;;  %s267_s24 = scalar_lea.hbm %s420_s0, 256 }
   0x6   :  { %s20_s21 = sshll.u32 %s339_s20, 4  ;;  %p268_p0 = scmp.ne.s32.totalorder %s420_s0, %s267_s24  ;;  %s21_s21 = int_to_ptr.vmem [resolvable:$true] %s20_s21 }
   0x7   :  { %p271_p1 = scmp.lt.u32.totalorder %s267_s24, %s420_s0 }
   0x9   :  { %p273_p2 = pnand %p271_p1, %p268_p0 }
   0xb   :  { %276 = shalt.err (!%p273_p2)
}
   0xc   :  { %s277_s4 = scalar_lea.vmem %s21_s21, 256  ;;  %p282_p4 = scmp.lt.s32.totalorder %s21_s21, %s21_s21 }
   0xd   :  { %p278_p3 = scmp.ne.s32.totalorder %s21_s21, %s277_s4  ;;  %p283_p5 = scmp.lt.s32.totalorder %s277_s4, %s277_s4 }
   0xf   :  { %p284_p6 = por %p283_p5, %p282_p4 }
  0x11   :  { %p285_p7 = pnand %p284_p6, %p278_p3 }
  0x13   :  { %288 = shalt.err (!%p285_p7)
}
  0x14   :  { %s340_s29 = smov 128   ;;  %s341_s30 = smov 8  }
  0x15   :  { %26 = dma.hbm_to_vmem [thread:$0]  %s420_s0, 256, %s21_s21, [#allocation4], %s340_s29, %s340_s29, %s341_s30  }
  0x16   :  { %s342_s8 = smov [#allocation6]   ;;  %s289_s12 = scalar_lea.hbm %s421_s1, 512 }
  0x17   :  { %s32_s9 = sshll.u32 %s342_s8, 4  ;;  %p290_p8 = scmp.ne.s32.totalorder %s421_s1, %s289_s12  ;;  %s33_s9 = int_to_ptr.vmem [resolvable:$true] %s32_s9 }
  0x18   :  { %p293_p9 = scmp.lt.u32.totalorder %s289_s12, %s421_s1 }
  0x1a   :  { %p295_p10 = pnand %p293_p9, %p290_p8 }
  0x1c   :  { %298 = shalt.err (!%p295_p10)
}
  0x1d   :  { %s299_s17 = scalar_lea.vmem %s33_s9, 512  ;;  %p304_p12 = scmp.lt.s32.totalorder %s33_s9, %s33_s9 }
  0x1e   :  { %p300_p11 = scmp.ne.s32.totalorder %s33_s9, %s299_s17  ;;  %p305_p13 = scmp.lt.s32.totalorder %s299_s17, %s299_s17 }
  0x20   :  { %p306_p0 = por %p305_p13, %p304_p12 }
  0x22   :  { %p307_p1 = pnand %p306_p0, %p300_p11 }
  0x24   :  { %310 = shalt.err (!%p307_p1)
}
  0x25   :  { %38 = dma.hbm_to_vmem [thread:$0]  %s421_s1, 512, %s33_s9, [#allocation7], %s340_s29, %s340_s29, %s341_s30  }
  0x26   :  { %333 = dma.done.wait [#allocation4], 256  }
  0x27   :  { %334 = vsyncadd [#allocation4], 4294967040 }
  0x28   :  { %335 = dma.done.wait [#allocation7], 512  }
  0x29   :  { %336 = vsyncadd [#allocation7], 4294966784  ;;  %vm64_vm0 = vcmask 261120   ;;  %v53_v1 = vld [vmem:[#allocation6] sm:$0xff]  ;;  %v54_v2 = vld [vmem:[#allocation6 + $0x8] sm:$0xff]  ;;  %vm148_vm1 = vcmask 523264   ;;  %v200_v44 = vlaneseq }
  0x2a   :  { %v55_v3 = vld [vmem:[#allocation6 + $0x10] sm:$0xff]  ;;  %v248_v4 = vpack.c.bf16 %v54_v2, %v53_v1  ;;  %v56_v5 = vld [vmem:[#allocation6 + $0x18] sm:$0xff]  ;;  %v225_v9 = vld [vmem:[%s422_s2] ss:$0 sm:$0xff]  ;;  %vm175_vm2 = vcmask 1041409   ;;  %vm178_vm3 = vcmask 517120  }
  0x2b   :  { %v51_v6 = vld [vmem:[#allocation3] sm:$0xff]  ;;  %v252_v7 = vpack.c.bf16 %v56_v5, %v55_v3  ;;  %v52_v8 = vld [vmem:[#allocation3 + $0x8] sm:$0xff]  ;;  %v228_v28 = vld [vmem:[%s423_s3] ss:$0 sm:$0xff]  ;;  %v343_v36 = vmov 0   ;;  %v201_v45 = vand.u32 127, %v200_v44 }
  0x2c   :  { %245 = vmatprep.mubr.msk.f32.mxu0 %vm64_vm0, %v51_v6  ;;  %249 = vmatprep.subr.bf16.mxu0 %v248_v4  ;;  %v229_v37 = vld [vmem:[#allocation2] ss:$0 sm:$0xff]  ;;  %v203_v46 = vshrl.u32 %v200_v44, 7  ;;  %s344_s3 = smov [#allocation8]   ;;  %vm207_vm4 = vcmask 8192  }
  0x2d   :  { %251 = vmatpush3.bf16.msra.mxu0 %v248_v4  ;;  %262 = vset.pattern.permute.xlu0 %v343_v36  ;;  %s215_s21 = sshll.u32 %s344_s3, 4  ;;  %s216_s21 = int_to_ptr.vmem [resolvable:$true] %s215_s21 }
  0x2e   :  { %253 = vmatprep.subr.bf16.mxu0 %v252_v7  ;;  %v204_v47 = vsub.s32 %v201_v45, %v203_v46  ;;  %s311_s22 = scalar_lea.vmem %s216_s21, 16  ;;  %s315_s23 = scalar_lea.vmem %s216_s21, 32 }
  0x2f   :  { %p312_p2 = scmp.ne.s32.totalorder %s216_s21, %s311_s22  ;;  %p316_p3 = scmp.lt.s32.totalorder %s216_s21, %s216_s21 }
  0x30   :  { %p317_p4 = scmp.lt.s32.totalorder %s315_s23, %s311_s22 }
  0x31   :  { %255 = vmatpush3.bf16.msra.mxu0 %v252_v7 }
  0x32   :  { %p318_p5 = por %p317_p4, %p316_p3 }
  0x34   :  { %246 = vmatmul.mubr.msk.f32.vlgmr.msra.gmra.mrb[0].mxu0 %vm64_vm0, %v52_v8  ;;  %p319_p6 = pnand %p318_p5, %p312_p2 }
 0x107   :  { %v247_v10 = vpop.f32.mrb[0].mxu0 }
 0x108   :  { %v143_v11 = vadd.f32 %v247_v10, %v225_v9  ;;  %v137_v12 = vpop.f32.mrb[1].mxu0 }
 0x109   :  { %v138_v13 = vadd.f32 %v225_v9, %v137_v12 }
 0x10a   :  { %v147_v14 = vmax.f32 %v143_v11, 0.0 }
 0x10b   :  { %v146_v15 = vmax.f32 %v138_v13, 0.0 }
 0x10c   :  { %v156_v16 = vsel %vm148_vm1, %v147_v14, 0.0 }
 0x10d   :  { %v157_v17 = vrot.slane %v156_v16, 4  ;;  %v149_v18 = vsel %vm148_vm1, %v146_v15, 0.0 }
 0x10e   :  { %v150_v19 = vrot.slane %v149_v18, 4 }
 0x10f   :  { %v158_v20 = vadd.f32 %v157_v17, %v156_v16 }
 0x110   :  { %v151_v21 = vadd.f32 %v150_v19, %v149_v18 }
 0x111   :  { %v159_v22 = vrot.slane %v158_v20, 2 }
 0x112   :  { %v152_v23 = vrot.slane %v151_v21, 2 }
 0x113   :  { %v160_v24 = vadd.f32 %v159_v22, %v158_v20 }
 0x114   :  { %v153_v25 = vadd.f32 %v152_v23, %v151_v21 }
 0x115   :  { %v161_v26 = vrot.slane %v160_v24, 1 }
 0x116   :  { %v154_v27 = vrot.slane %v153_v25, 1 }
 0x117   :  { %v162_v29 = vadd.f32 %v161_v26, %v160_v24 }
 0x118   :  { %v155_v30 = vadd.f32 %v154_v27, %v153_v25 }
 0x119   :  { %v171_v31 = vmul.f32 %v228_v28, %v162_v29 }
 0x11a   :  { %v170_v32 = vmul.f32 %v228_v28, %v155_v30 }
 0x11b   :  { %v174_v33 = vrot.slane %v171_v31, 7 }
 0x11d   :  { %v176_v34 = vsel %vm175_vm2, %v174_v33, %v170_v32 }
 0x11e   :  { %v179_v35 = vsel %vm178_vm3, %v176_v34, 0.0 }
 0x11f   :  { %180 = vadd.xlane.f32.xlu0 %v179_v35 }
 0x1ac   :  { %v181_v38 = vpop.xlane.xlu0 %180 }
 0x1ad   :  { %v189_v39 = vadd.f32 %v229_v37, %v181_v38 }
 0x1af   :  { %v230_v40 = vmul.f32 -1.442695, %v189_v39 }
 0x1b1   :  { %263 = vpow2.f32 %v230_v40 }
 0x1bb   :  { %v264_v41 = vpop.eup %263 }
 0x1bc   :  { %v193_v42 = vadd.f32 1.0, %v264_v41 }
 0x1be   :  { %265 = vrcp.f32 %v193_v42 }
 0x1c8   :  { %v266_v43 = vpop.eup %265 }
 0x1c9   :  { %198 = vperm.xlu0 %262, %v266_v43  }
 0x248   :  { %v199_v48 = vpop.permute.xlu0 %198 }
 0x249   :  { %v205_v49 = vrot.slane %v199_v48, %v204_v47 }
 0x24b   :  { %208 = vst.msk [vmem:[#allocation8] sm:$0x1] %vm207_vm4, %v205_v49 }
 0x24c   :  { %322 = shalt.err (!%p319_p6)
}
 0x24d   :  { %s323_s26 = scalar_lea.hbm %s425_s5, 16 }
 0x24e   :  { %p324_p7 = scmp.ne.s32.totalorder %s425_s5, %s323_s26  ;;  %p327_p8 = scmp.lt.u32.totalorder %s323_s26, %s425_s5 }
 0x250   :  { %p329_p9 = pnand %p327_p8, %p324_p7 }
 0x252   :  { %332 = shalt.err (!%p329_p9)
}
 0x253   :  { %218 = dma.vmem_to_hbm [thread:$0]  %s216_s21, 16, %s425_s5, [#allocation5]  }
 0x254   :  { %337 = dma.done.wait [#allocation5], 16  }
 0x255   :  { %338 = vsyncadd [#allocation5], 4294967280 }
 0x256   :  { %222 = vsyncpa [#allocation4], 1 }
 0x257   :  { %223 = vsyncpa [#allocation7], 1 }
 0x258   :  { %224 = vsyncpa [#allocation5], 1 }

</bundles_post_ra>
